<compile_context>
chip_gen: v5e
topology: v5e:2x2
jax: 0.10.0
libtpu: 0.0.40
codegen_flags: <defaults>
</compile_context>

<pallas_src>
import functools

import jax
import jax.numpy as jnp
from jax.experimental import pallas as pl
from jax.experimental.pallas import tpu as pltpu

ALPHA = 0.7
GAMMA = 8.0  # integer power -> expanded as repeated squaring in-kernel

LANES = 128
MAX_TILE_R = 2048  # 2048*128*4B = 1 MiB per input buffer


def _round_up(x, m):
    return ((x + m - 1) // m) * m


def _focal_loss_kernel(x_ref, t_ref, psum_ref, *, tile_r, total_count):
    i = pl.program_id(0)

    x = x_ref[...].astype(jnp.float32)
    t = t_ref[...].astype(jnp.float32)

    # Stable BCE with logits (matches torch.binary_cross_entropy_with_logits):
    #   max(x, 0) - x*t + log(1 + exp(-|x|))
    bce = jnp.maximum(x, 0.0) - x * t + jnp.log1p(jnp.exp(-jnp.abs(x)))
    pt = jnp.exp(-bce)

    # (1 - pt) ** 8 via repeated squaring: pure VPU muls, no extra EUP work.
    q = 1.0 - pt
    q2 = q * q
    q4 = q2 * q2
    q8 = q4 * q4
    focal = ALPHA * q8 * bce

    # Mask out the padded tail (elements with global flat index >= total).
    row = jax.lax.broadcasted_iota(jnp.int32, (tile_r, LANES), 0)
    col = jax.lax.broadcasted_iota(jnp.int32, (tile_r, LANES), 1)
    flat = (i * tile_r + row) * LANES + col
    focal = jnp.where(flat < total_count, focal, 0.0)

    # Per-block vreg-shaped partial sum: VPU adds only, no XLU cross-lane
    # reduce and no serialized scalar accumulator.
    psum_ref[...] = focal.reshape(tile_r // 8, 8, LANES).sum(axis=0)


def focal_loss(inputs, targets):
    """Focal loss (alpha=0.7, gamma=8.0, reduction='mean') for any shape."""
    assert inputs.shape == targets.shape
    total = inputs.size

    rows = -(-total // LANES)                      # ceil-div
    tile_r = min(MAX_TILE_R, _round_up(rows, 8))   # adapt tile to input size
    rows_padded = _round_up(rows, tile_r)
    padded_total = rows_padded * LANES

    x = inputs.reshape(-1)
    t = targets.reshape(-1)
    if padded_total != total:
        x = jnp.pad(x, (0, padded_total - total))
        t = jnp.pad(t, (0, padded_total - total))
    x2 = x.reshape(rows_padded, LANES)
    t2 = t.reshape(rows_padded, LANES)

    grid = (rows_padded // tile_r,)

    partial = pl.pallas_call(
        functools.partial(_focal_loss_kernel, tile_r=tile_r, total_count=total),
        out_shape=jax.ShapeDtypeStruct((grid[0] * 8, LANES), jnp.float32),
        grid_spec=pltpu.PrefetchScalarGridSpec(
            num_scalar_prefetch=0,
            grid=grid,
            in_specs=[
                pl.BlockSpec((tile_r, LANES), lambda i: (i, 0)),
                pl.BlockSpec((tile_r, LANES), lambda i: (i, 0)),
            ],
            out_specs=pl.BlockSpec((8, LANES), lambda i: (i, 0)),
        ),
        compiler_params=pltpu.CompilerParams(
            # Independent per-block partials -> fully parallel grid axis
            # (lets v7x shard across both TensorCores).
            dimension_semantics=("parallel",),
        ),
    )(x2, t2)

    # Tiny final reduce (1/1024 of the input size) + mean normalization.
    return jnp.sum(partial) / total


def focal_loss_ref(inputs, targets):
    x = inputs.astype(jnp.float32)
    t = targets.astype(jnp.float32)
    bce = jnp.maximum(x, 0.0) - x * t + jnp.log1p(jnp.exp(-jnp.abs(x)))
    pt = jnp.exp(-bce)
    return jnp.mean(ALPHA * (1.0 - pt) ** GAMMA * bce)


if __name__ == "__main__":
    key = jax.random.PRNGKey(0)
    k1, k2, k3, k4 = jax.random.split(key, 4)

    # Small NCHW segmentation-style logits: (B=2, C=4, H=16, W=16).
    x = jax.random.normal(k1, (2, 4, 16, 16), dtype=jnp.float32) * 2.0
    targets = (jax.random.uniform(k2, (2, 4, 16, 16)) > 0.5).astype(jnp.float32)

    loss = focal_loss(x, targets)
    jax.block_until_ready(loss)
    ref = focal_loss_ref(x, targets)
    assert jnp.allclose(loss, ref, rtol=1e-5, atol=1e-6), (loss, ref)

    # Non-multiple-of-1024 shape exercises the pad + in-kernel mask path.
    x2 = jax.random.normal(k3, (3, 5, 7, 9), dtype=jnp.float32) * 2.0
    t2 = (jax.random.uniform(k4, (3, 5, 7, 9)) > 0.5).astype(jnp.float32)
    loss2 = focal_loss(x2, t2)
    jax.block_until_ready(loss2)
    ref2 = focal_loss_ref(x2, t2)
    assert jnp.allclose(loss2, ref2, rtol=1e-5, atol=1e-6), (loss2, ref2)

    print("KERNEL_OK")
</pallas_src>

<mosaic_0001>
module attributes {stable_mosaic.version = 11 : i64} {
  func.func @_focal_loss_kernel(%arg0: i32, %arg1: memref<16x128xf32, #tpu.memory_space<vmem>>, %arg2: memref<16x128xf32, #tpu.memory_space<vmem>>, %arg3: memref<8x128xf32, #tpu.memory_space<vmem>>) attributes {dimension_semantics = [#tpu.dimension_semantics<parallel>], iteration_bounds = array<i64: 1>, scalar_prefetch = 0 : i64, scratch_operands = 0 : i64, tpu.core_type = #tpu.core_type<tc>, window_params = [{transform_indices = @transform_0, window_bounds = array<i64: 16, 128>}, {transform_indices = @transform_1, window_bounds = array<i64: 16, 128>}, {transform_indices = @transform_2, window_bounds = array<i64: 8, 128>}]} {
    %c0 = arith.constant 0 : index
    %c0_0 = arith.constant 0 : index
    %0 = vector.load %arg1[%c0, %c0_0] : memref<16x128xf32, #tpu.memory_space<vmem>>, vector<16x128xf32>
    %c0_1 = arith.constant 0 : index
    %c0_2 = arith.constant 0 : index
    %1 = vector.load %arg2[%c0_1, %c0_2] : memref<16x128xf32, #tpu.memory_space<vmem>>, vector<16x128xf32>
    %cst = arith.constant 0.000000e+00 : f32
    %2 = vector.broadcast %cst : f32 to vector<16x128xf32>
    %3 = arith.maximumf %0, %2 : vector<16x128xf32>
    %4 = arith.mulf %0, %1 : vector<16x128xf32>
    %5 = arith.subf %3, %4 : vector<16x128xf32>
    %6 = math.absf %0 : vector<16x128xf32>
    %cst_3 = arith.constant 0.000000e+00 : f32
    %7 = vector.broadcast %cst_3 : f32 to vector<16x128xf32>
    %8 = arith.subf %7, %6 : vector<16x128xf32>
    %9 = math.exp %8 : vector<16x128xf32>
    %10 = math.log1p %9 : vector<16x128xf32>
    %11 = arith.addf %5, %10 : vector<16x128xf32>
    %cst_4 = arith.constant 0.000000e+00 : f32
    %12 = vector.broadcast %cst_4 : f32 to vector<16x128xf32>
    %13 = arith.subf %12, %11 : vector<16x128xf32>
    %14 = math.exp %13 : vector<16x128xf32>
    %cst_5 = arith.constant 1.000000e+00 : f32
    %15 = vector.broadcast %cst_5 : f32 to vector<16x128xf32>
    %16 = arith.subf %15, %14 : vector<16x128xf32>
    %17 = arith.mulf %16, %16 : vector<16x128xf32>
    %18 = arith.mulf %17, %17 : vector<16x128xf32>
    %19 = arith.mulf %18, %18 : vector<16x128xf32>
    %cst_6 = arith.constant 0.699999988 : f32
    %20 = vector.broadcast %cst_6 : f32 to vector<16x128xf32>
    %21 = arith.mulf %20, %19 : vector<16x128xf32>
    %22 = arith.mulf %21, %11 : vector<16x128xf32>
    %23 = tpu.iota {dimensions = array<i32: 0>} : vector<16x128xi32>
    %24 = tpu.iota {dimensions = array<i32: 1>} : vector<16x128xi32>
    %c16_i32 = arith.constant 16 : i32
    %25 = arith.muli %arg0, %c16_i32 : i32
    %26 = vector.broadcast %25 : i32 to vector<16x128xi32>
    %27 = arith.addi %26, %23 : vector<16x128xi32>
    %c128_i32 = arith.constant 128 : i32
    %28 = vector.broadcast %c128_i32 : i32 to vector<16x128xi32>
    %29 = arith.muli %27, %28 : vector<16x128xi32>
    %30 = arith.addi %29, %24 : vector<16x128xi32>
    %c2048_i32 = arith.constant 2048 : i32
    %31 = vector.broadcast %c2048_i32 : i32 to vector<16x128xi32>
    %32 = arith.cmpi slt, %30, %31 : vector<16x128xi32>
    %cst_7 = arith.constant 0.000000e+00 : f32
    %33 = vector.broadcast %cst_7 : f32 to vector<16x128xf32>
    %34 = arith.select %32, %22, %33 : vector<16x128xi1>, vector<16x128xf32>
    %35 = vector.shape_cast %34 : vector<16x128xf32> to vector<2x8x128xf32>
    %cst_8 = arith.constant dense<0.000000e+00> : vector<8x128xf32>
    %36 = vector.multi_reduction <add>, %35, %cst_8 [0] : vector<2x8x128xf32> to vector<8x128xf32>
    %c0_9 = arith.constant 0 : index
    %c0_10 = arith.constant 0 : index
    %37 = vector.load %arg3[%c0_9, %c0_10] : memref<8x128xf32, #tpu.memory_space<vmem>>, vector<8x128xf32>
    tpu.vector_store %arg3[%c0_9, %c0_10], %36 {strides = array<i32>} : memref<8x128xf32, #tpu.memory_space<vmem>>, vector<8x128xf32>,
    return
  }
  func.func @transform_0(%arg0: i32) -> (i32, i32) {
    %c0_i32 = arith.constant 0 : i32
    %c0_i32_0 = arith.constant 0 : i32
    return %arg0, %c0_i32 : i32, i32
  }
  func.func @transform_1(%arg0: i32) -> (i32, i32) {
    %c0_i32 = arith.constant 0 : i32
    %c0_i32_0 = arith.constant 0 : i32
    return %arg0, %c0_i32 : i32, i32
  }
  func.func @transform_2(%arg0: i32) -> (i32, i32) {
    %c0_i32 = arith.constant 0 : i32
    %c0_i32_0 = arith.constant 0 : i32
    return %arg0, %c0_i32 : i32, i32
  }
}

</mosaic_0001>

<bundles_post_ra>
// kernel: tpu_custom_call.1
= control target key start
LH: loop header
LB: loop body
LE: loop exit
PB: predicated region body
PF: predicated region fallthrough
CT: control target
= control target key end

     0   :  { %7 = vsyncpa [#allocation3], 0  ;;  %s261_s0 = inlined_call_operand.hbm [shape: f32[16,128], index: 0, kind: input, shape index: {}]   ;;  %s262_s1 = inlined_call_operand.hbm [shape: f32[16,128], index: 1, kind: input, shape index: {}]   ;;  %s263_s2 = inlined_call_operand.hbm [shape: f32[8,128], index: 2, kind: output, shape index: {}]  }
   0x1   :  { %8 = vsyncpa [#allocation6], 0 }
   0x2   :  { %9 = vsyncpa [#allocation4], 0  ;;  %s14_s11 = sshll.u32 %s261_s0, 4  ;;  %s232_s12 = smov [#allocation2]   ;;  %s15_s11 = int_to_ptr.hbm [resolvable:$true] %s14_s11 }
   0x3   :  { %s16_s13 = sshll.u32 %s232_s12, 4  ;;  %s27_s16 = sshll.u32 %s262_s1, 4  ;;  %s17_s13 = int_to_ptr.vmem [resolvable:$true] %s16_s13  ;;  %s28_s16 = int_to_ptr.hbm [resolvable:$true] %s27_s16 }
   0x4   :  { %s233_s17 = smov 128   ;;  %s234_s18 = smov 8  }
   0x5   :  { %22 = dma.hbm_to_vmem [thread:$0]  %s15_s11, 256, %s17_s13, [#allocation3], %s233_s17, %s233_s17, %s234_s18  }
   0x6   :  { %s235_s19 = smov [#allocation5]  }
   0x7   :  { %s29_s20 = sshll.u32 %s235_s19, 4  ;;  %s30_s20 = int_to_ptr.vmem [resolvable:$true] %s29_s20 }
   0x8   :  { %35 = dma.hbm_to_vmem [thread:$0]  %s28_s16, 256, %s30_s20, [#allocation6], %s233_s17, %s233_s17, %s234_s18  }
   0x9   :  { %226 = dma.done.wait [#allocation3], 256  }
   0xa   :  { %227 = vsyncadd [#allocation3], 4294967040 }
   0xb   :  { %228 = dma.done.wait [#allocation6], 256  }
   0xc   :  { %229 = vsyncadd [#allocation6], 4294967040  ;;  %v44_v0 = vld [vmem:[#allocation2] sm:$0xff]  ;;  %v45_v1 = vld [vmem:[#allocation2 + $0x8] sm:$0xff]  ;;  %v100_v38 = vlaneseq  ;;  %s236_s0 = smov [#allocation7]   ;;  %s126_s23 = sshll.u32 %s263_s2, 4  ;;  %s127_s23 = int_to_ptr.hbm [resolvable:$true] %s126_s23 }
   0xd   :  { %v54_v2 = vand.u32 2147483647, %v44_v0  ;;  %v55_v3 = vand.u32 2147483647, %v45_v1  ;;  %v46_v12 = vld [vmem:[#allocation5] sm:$0xff]  ;;  %v47_v15 = vld [vmem:[#allocation5 + $0x8] sm:$0xff] }
   0xe   :  { %v48_v17 = vmax.f32 %v44_v0, 0.0  ;;  %v50_v18 = vmul.f32 %v46_v12, %v44_v0  ;;  %v49_v21 = vmax.f32 %v45_v1, 0.0  ;;  %v51_v22 = vmul.f32 %v47_v15, %v45_v1  ;;  %s124_s1 = sshll.u32 %s236_s0, 4  ;;  %s125_s1 = int_to_ptr.vmem [resolvable:$true] %s124_s1 }
   0xf   :  { %v56_v4 = vsub.f32 0.0, %v54_v2  ;;  %v57_v5 = vsub.f32 0.0, %v55_v3  ;;  %v101_v41 = vshrl.u32 %v100_v38, 7  ;;  %v104_v47 = vand.u32 127, %v100_v38 }
  0x10   :  { %v52_v26 = vsub.f32 %v48_v17, %v50_v18  ;;  %v53_v29 = vsub.f32 %v49_v21, %v51_v22 }
  0x11   :  { %v58_v6 = vmul.f32 1.442695, %v56_v4  ;;  %v60_v7 = vmul.f32 1.442695, %v57_v5  ;;  %v102_v42 = vadd.s32 8, %v101_v41  ;;  %v109_v48 = vmul.u32 128, %v101_v41 }
  0x13   :  { %142 = vpow2.f32 %v58_v6  ;;  %v110_v50 = vmul.u32 128, %v102_v42  ;;  %v111_v54 = vadd.s32 %v109_v48, %v104_v47 }
  0x14   :  { %144 = vpow2.f32 %v60_v7 }
  0x15   :  { %v112_v56 = vadd.s32 %v110_v50, %v104_v47  ;;  %vm113_vm2 = vcmp.lt.s32.totalorder %v111_v54, 2048 }
  0x17   :  { %vm114_vm3 = vcmp.lt.s32.totalorder %v112_v56, 2048 }
  0x19   :  { %v143_v8 = vpop.eup %142 }
  0x1a   :  { %v145_v9 = vpop.eup %144  ;;  %v62_v10 = vadd.f32 1.0, %v143_v8  ;;  %v65_v11 = vmul.f32 -0.5, %v143_v8  ;;  %v68_v19 = vand.u32 2147483647, %v143_v8 }
  0x1b   :  { %v71_v13 = vadd.f32 1.0, %v145_v9  ;;  %v74_v14 = vmul.f32 -0.5, %v145_v9  ;;  %v77_v23 = vand.u32 2147483647, %v145_v9 }
  0x1c   :  { %146 = vlog2.f32 %v62_v10  ;;  %v66_v16 = vadd.f32 1.0, %v65_v11  ;;  %vm69_vm0 = vcmp.lt.f32.partialorder %v68_v19, 0.0004427343 }
  0x1d   :  { %148 = vlog2.f32 %v71_v13  ;;  %v75_v20 = vadd.f32 1.0, %v74_v14  ;;  %vm78_vm1 = vcmp.lt.f32.partialorder %v77_v23, 0.0004427343 }
  0x1e   :  { %v67_v24 = vmul.f32 %v143_v8, %v66_v16 }
  0x1f   :  { %v76_v27 = vmul.f32 %v145_v9, %v75_v20 }
  0x22   :  { %v147_v25 = vpop.eup %146 }
  0x23   :  { %v149_v28 = vpop.eup %148  ;;  %v64_v30 = vmul.f32 0.6931472, %v147_v25 }
  0x24   :  { %v73_v31 = vmul.f32 0.6931472, %v149_v28 }
  0x25   :  { %v70_v32 = vsel %vm69_vm0, %v67_v24, %v64_v30 }
  0x26   :  { %v79_v33 = vsel %vm78_vm1, %v76_v27, %v73_v31  ;;  %v80_v34 = vadd.f32 %v70_v32, %v52_v26 }
  0x27   :  { %v81_v35 = vadd.f32 %v79_v33, %v53_v29 }
  0x28   :  { %v82_v36 = vsub.f32 0.0, %v80_v34 }
  0x29   :  { %v83_v37 = vsub.f32 0.0, %v81_v35 }
  0x2a   :  { %v84_v39 = vmul.f32 1.442695, %v82_v36 }
  0x2b   :  { %v86_v40 = vmul.f32 1.442695, %v83_v37 }
  0x2c   :  { %150 = vpow2.f32 %v84_v39 }
  0x2d   :  { %152 = vpow2.f32 %v86_v40 }
  0x32   :  { %v151_v43 = vpop.eup %150 }
  0x33   :  { %v153_v44 = vpop.eup %152  ;;  %v88_v45 = vsub.f32 1.0, %v151_v43 }
  0x34   :  { %v89_v46 = vsub.f32 1.0, %v153_v44 }
  0x35   :  { %v90_v49 = vmul.f32 %v88_v45, %v88_v45 }
  0x36   :  { %v91_v51 = vmul.f32 %v89_v46, %v89_v46 }
  0x37   :  { %v92_v52 = vmul.f32 %v90_v49, %v90_v49 }
  0x38   :  { %v93_v53 = vmul.f32 %v91_v51, %v91_v51 }
  0x39   :  { %v94_v55 = vmul.f32 %v92_v52, %v92_v52 }
  0x3a   :  { %v95_v57 = vmul.f32 %v93_v53, %v93_v53 }
  0x3b   :  { %v96_v58 = vmul.f32 0.7, %v94_v55 }
  0x3c   :  { %v97_v59 = vmul.f32 0.7, %v95_v57 }
  0x3d   :  { %v98_v60 = vmul.f32 %v96_v58, %v80_v34 }
  0x3e   :  { %v99_v61 = vmul.f32 %v97_v59, %v81_v35 }
  0x3f   :  { %v115_v62 = vsel %vm113_vm2, %v98_v60, 0.0 }
  0x40   :  { %v116_v63 = vsel %vm114_vm3, %v99_v61, 0.0 }
  0x41   :  { %v117_v0 = vadd.f32 %v116_v63, %v115_v62 }
  0x43   :  { %118 = vst [vmem:[#allocation7] sm:$0xff] %v117_v0 }
  0x44   :  { %129 = dma.vmem_to_hbm [thread:$0]  %s125_s1, 128, %s127_s23, [#allocation4]  }
  0x45   :  { %230 = dma.done.wait [#allocation4], 128  }
  0x46   :  { %231 = vsyncadd [#allocation4], 4294967168 }
  0x47   :  { %134 = vsyncpa [#allocation3], 1 }
  0x48   :  { %135 = vsyncpa [#allocation6], 1 }
  0x49   :  { %136 = vsyncpa [#allocation4], 1 }

</bundles_post_ra>
